<compile_context>
chip_gen: v7x
topology: tpu7x:2x2x1
jax: 0.10.0
libtpu: 0.0.40
codegen_flags: <defaults>
</compile_context>

<pallas_src>
import functools
import math

import jax
import jax.numpy as jnp
from jax import lax
from jax.experimental import pallas as pl
from jax.experimental.pallas import tpu as pltpu

LANES = 128  # lane width: pad Cout to this so stores are unmasked vst's


def _round_up(x, m):
    return ((x + m - 1) // m) * m


def _divisor_at_most(n, cap):
    cap = int(max(1, min(cap, n)))
    for d in range(cap, 0, -1):
        if n % d == 0:
            return d
    return 1


def _vmem_budget():
    """(per-pass double-buffered working-set budget, scoped vmem limit) in bytes."""
    try:
        cap = int(pltpu.get_tpu_info().vmem_capacity_bytes)
    except Exception:
        cap = 64 * 1024 * 1024                      # v7x-safe fallback (64 MiB / TC)
    budget = min(max(2 * 1024 * 1024, cap // 6), 24 * 1024 * 1024)
    limit = min(max(32 * 1024 * 1024, (cap * 3) // 4), 64 * 1024 * 1024)
    return budget, limit


# ----------------------------------------------------------------------------
# Pass 1 (batch-norm path): im2col matmul -> bf16 y + per-tile f32 BN statistics
# ----------------------------------------------------------------------------
def _conv_stats_kernel(p_ref, w_ref, y_ref, st_ref):
    acc = jnp.dot(p_ref[...], w_ref[...], preferred_element_type=jnp.float32)
    y_ref[...] = acc.astype(y_ref.dtype)                      # bf16 intermediate
    s = jnp.sum(acc, axis=0, keepdims=True)                   # (1, Cpad), from f32 acc
    sq = jnp.sum(acc * acc, axis=0, keepdims=True)            # (1, Cpad)
    st_ref[0] = jnp.concatenate([s, sq], axis=0)              # (2, Cpad)


# ----------------------------------------------------------------------------
# Pass 1 (no-BN path): conv + bias + ReLU + AvgPool fused (no (M, C) intermediate)
# ----------------------------------------------------------------------------
def _make_conv_bias_relu_pool_kernel(g, pw, inv_pp):
    def kernel(p_ref, w_ref, b_ref, q_ref, o_ref):
        acc = jnp.dot(p_ref[...], w_ref[...], preferred_element_type=jnp.float32)
        # ReLU(x + b)/pp == ReLU(x/pp + b/pp); b_ref already carries bias/pp.
        v = jnp.maximum(acc * inv_pp + b_ref[...], 0.0)        # (g*pw, Cpad)
        v = v.reshape(g, pw, acc.shape[-1])                    # leading-dim split only
        # AvgPool (both spatial dims) as a tiny batched MXU matmul per band.
        o_ref[...] = jnp.einsum('gop,gpc->goc', q_ref[...], v,
                                preferred_element_type=jnp.float32)
    return kernel


# ----------------------------------------------------------------------------
# Pass 2 (batch-norm path): folded per-channel scale/shift + ReLU + AvgPool matmul
# ----------------------------------------------------------------------------
def _bn_relu_pool_kernel(y_ref, sc_ref, sh_ref, q_ref, o_ref):
    v = y_ref[...].astype(jnp.float32)                         # (G, p*W, Cpad)
    v = jnp.maximum(v * sc_ref[...] + sh_ref[...], 0.0)        # scale/shift include 1/pp
    o_ref[...] = jnp.einsum('gop,gpc->goc', q_ref[...], v,
                            preferred_element_type=jnp.float32)


# ----------------------------------------------------------------------------
# Wrapper
# ----------------------------------------------------------------------------
def conv_block_forward(x_nchw, weight, bias, gamma, beta, *,
                       avg_pool_size: int, batch_norm: bool, eps: float = 1e-5):
    N, Cin, H, W = x_nchw.shape
    KH, KW, _, Cout = weight.shape
    assert (KH, KW) == (3, 3)
    p = max(int(avg_pool_size), 1)
    # TODO(synk): non-divisible AvgPool (PyTorch floors the output) would need masked pooling.
    assert H % p == 0 and W % p == 0, "H, W must be divisible by avg_pool_size"

    Ho, Wo = H // p, W // p
    PW = p * W                     # rows of one pooling band (p image scanlines)
    NB = N * Ho                    # number of pooling bands
    M = NB * PW                    # = N*H*W conv-output rows, natural (n, h, w) order
    M2 = NB * Wo                   # pooled rows
    pp = p * p
    inv_pp = 1.0 / float(pp)
    K0 = 9 * Cin
    Kpad = _round_up(K0, 8)
    Cpad = _round_up(max(Cout, LANES), LANES)

    budget, vmem_limit = _vmem_budget()

    # ---- glue: NCHW -> NHWC bf16, zero-pad, im2col in NATURAL row order (no transpose) ----
    xh = jnp.transpose(x_nchw, (0, 2, 3, 1)).astype(jnp.bfloat16)
    xp = jnp.pad(xh, ((0, 0), (1, 1), (1, 1), (0, 0)))
    pat = jnp.concatenate(
        [xp[:, ky:ky + H, kx:kx + W, :] for ky in range(3) for kx in range(3)], axis=-1)
    if Kpad > K0:
        pat = jnp.pad(pat, ((0, 0), (0, 0), (0, 0), (0, Kpad - K0)))
    patches = pat.reshape(M, Kpad)                             # bf16, (n, h, w) row order
    # TODO(synk): halo-DMA direct conv (9 tap matmuls) would avoid materializing this array.

    w_mat = weight.reshape(K0, Cout).astype(jnp.float32)
    w_mat = jnp.pad(w_mat, ((0, Kpad - K0), (0, Cpad - Cout))).astype(jnp.bfloat16)
    b_pad = jnp.pad(bias.astype(jnp.float32), (0, Cpad - Cout))
    g_pad = jnp.pad(gamma.astype(jnp.float32), (0, Cpad - Cout))
    be_pad = jnp.pad(beta.astype(jnp.float32), (0, Cpad - Cout))

    # AvgPool selection matrix qt[o, r] = 1 iff in-band row r (= pi*W + w) pools into col o.
    ridx = jnp.arange(PW, dtype=jnp.int32)
    qt = (((ridx % W) // p)[None, :] ==
          jnp.arange(Wo, dtype=jnp.int32)[:, None]).astype(jnp.float32)   # (Wo, PW)

    def pick_bands(per_band_bytes, need_8row_blocks):
        g = max(1, budget // max(1, 2 * per_band_bytes))       # double-buffered blocks
        g = min(g, 256, NB)
        if NB >= 2:
            g = min(g, NB // 2)                                 # >= 2 grid steps (megacore)
        g = max(1, g)
        g = _divisor_at_most(NB, g)
        if need_8row_blocks and (g * PW) % 8 != 0:
            g = NB                                              # full-extent block is always legal
        return g

    if batch_norm:
        # ---- pass 1: conv matmul + per-tile (sum, sumsq) -----------------------------
        per_band1 = PW * Kpad * 2 + PW * Cpad * 2 + 2 * Cpad * 4
        G1 = pick_bands(per_band1, True)
        tiles1 = NB // G1
        tile_m1 = G1 * PW

        cost1 = pl.CostEstimate(
            flops=2 * M * Kpad * Cpad, transcendentals=0,
            bytes_accessed=M * Kpad * 2 + Kpad * Cpad * 2 + M * Cpad * 2
                           + tiles1 * 2 * Cpad * 4)

        y, stats = pl.pallas_call(
            _conv_stats_kernel,
            out_shape=(jax.ShapeDtypeStruct((M, Cpad), jnp.bfloat16),
                       jax.ShapeDtypeStruct((tiles1, 2, Cpad), jnp.float32)),
            grid=(tiles1,),
            in_specs=[pl.BlockSpec((tile_m1, Kpad), lambda i: (i, 0)),
                      pl.BlockSpec((Kpad, Cpad), lambda i: (0, 0))],
            out_specs=(pl.BlockSpec((tile_m1, Cpad), lambda i: (i, 0)),
                       pl.BlockSpec((1, 2, Cpad), lambda i: (i, 0, 0))),
            compiler_params=pltpu.CompilerParams(
                dimension_semantics=("parallel",), vmem_limit_bytes=vmem_limit),
            cost_estimate=cost1,
        )(patches, w_mat)

        # ---- per-channel glue: fold BN (training-mode, biased var) + 1/pp ------------
        ssum = jnp.sum(stats[:, 0, :], axis=0)
        ssq = jnp.sum(stats[:, 1, :], axis=0)
        mean = ssum / float(M)
        # TODO(synk): E[x^2]-E[x]^2 can cancel when |mean| >> std; fine at these scales.
        var = jnp.maximum(ssq / float(M) - mean * mean, 0.0)
        scale = g_pad * lax.rsqrt(var + eps)
        shift = be_pad - mean * scale            # conv bias cancels exactly under batch norm
        scale = (scale * inv_pp).reshape(1, 1, Cpad)
        shift = (shift * inv_pp).reshape(1, 1, Cpad)

        # ---- pass 2: scale/shift + ReLU + AvgPool (pool = small MXU matmul per band) --
        per_band2 = PW * Cpad * 2 + Wo * Cpad * 4 + Wo * PW * 4
        G2 = pick_bands(per_band2, False)
        tiles2 = NB // G2
        y3 = y.reshape(NB, PW, Cpad)             # free reshape (row-major split, lanes kept)
        qb2 = jnp.broadcast_to(qt[None], (G2, Wo, PW))

        cost2 = pl.CostEstimate(
            flops=4 * M * Cpad + 2 * NB * Wo * PW * Cpad, transcendentals=0,
            bytes_accessed=M * Cpad * 2 + M2 * Cpad * 4 + G2 * Wo * PW * 4 + 2 * Cpad * 4)

        out3 = pl.pallas_call(
            _bn_relu_pool_kernel,
            out_shape=jax.ShapeDtypeStruct((NB, Wo, Cpad), jnp.float32),
            grid=(tiles2,),
            in_specs=[pl.BlockSpec((G2, PW, Cpad), lambda i: (i, 0, 0)),
                      pl.BlockSpec((1, 1, Cpad), lambda i: (0, 0, 0)),
                      pl.BlockSpec((1, 1, Cpad), lambda i: (0, 0, 0)),
                      pl.BlockSpec((G2, Wo, PW), lambda i: (0, 0, 0))],
            out_specs=pl.BlockSpec((G2, Wo, Cpad), lambda i: (i, 0, 0)),
            compiler_params=pltpu.CompilerParams(
                dimension_semantics=("parallel",), vmem_limit_bytes=vmem_limit),
            cost_estimate=cost2,
        )(y3, scale, shift, qb2)
    else:
        # ---- single fused pass: conv + bias + ReLU + AvgPool -------------------------
        per_band1 = PW * Kpad * 2 + Wo * Cpad * 4 + Wo * PW * 4
        G1 = pick_bands(per_band1, True)
        tiles1 = NB // G1
        tile_m1 = G1 * PW
        qb1 = jnp.broadcast_to(qt[None], (G1, Wo, PW))
        b_row = (b_pad * inv_pp).reshape(1, Cpad)

        cost1 = pl.CostEstimate(
            flops=2 * M * Kpad * Cpad + 2 * NB * Wo * PW * Cpad, transcendentals=0,
            bytes_accessed=M * Kpad * 2 + Kpad * Cpad * 2 + M2 * Cpad * 4
                           + G1 * Wo * PW * 4 + Cpad * 4)

        out3 = pl.pallas_call(
            _make_conv_bias_relu_pool_kernel(G1, PW, inv_pp),
            out_shape=jax.ShapeDtypeStruct((NB, Wo, Cpad), jnp.float32),
            grid=(tiles1,),
            in_specs=[pl.BlockSpec((tile_m1, Kpad), lambda i: (i, 0)),
                      pl.BlockSpec((Kpad, Cpad), lambda i: (0, 0)),
                      pl.BlockSpec((1, Cpad), lambda i: (0, 0)),
                      pl.BlockSpec((G1, Wo, PW), lambda i: (0, 0, 0))],
            out_specs=pl.BlockSpec((G1, Wo, Cpad), lambda i: (i, 0, 0)),
            compiler_params=pltpu.CompilerParams(
                dimension_semantics=("parallel",), vmem_limit_bytes=vmem_limit),
            cost_estimate=cost1,
        )(patches, w_mat, b_row, qb1)

    out = out3[:, :, :Cout].reshape(N, Ho, Wo, Cout)
    return jnp.transpose(out, (0, 3, 1, 2)).astype(jnp.float32)   # back to NCHW


# ----------------------------------------------------------------------------
# Pure-JAX reference (mirrors bf16 MXU operands with f32 accumulation)
# ----------------------------------------------------------------------------
def reference_forward(x_nchw, weight, bias, gamma, beta, *,
                      avg_pool_size: int, batch_norm: bool, eps: float = 1e-5):
    x = jnp.transpose(x_nchw, (0, 2, 3, 1)).astype(jnp.bfloat16)
    y = lax.conv_general_dilated(
        x, weight.astype(jnp.bfloat16), window_strides=(1, 1),
        padding=((1, 1), (1, 1)), dimension_numbers=("NHWC", "HWIO", "NHWC"),
        preferred_element_type=jnp.float32)
    y = y + bias.astype(jnp.float32)
    if batch_norm:
        mean = jnp.mean(y, axis=(0, 1, 2), keepdims=True)
        var = jnp.mean((y - mean) ** 2, axis=(0, 1, 2), keepdims=True)
        y = (y - mean) * lax.rsqrt(var + eps) * gamma + beta
    y = jnp.maximum(y, 0.0)
    if avg_pool_size > 1:
        p = avg_pool_size
        N, H, W, C = y.shape
        y = y[:, :H // p * p, :W // p * p, :].reshape(
            N, H // p, p, W // p, p, C).mean(axis=(2, 4))
    return jnp.transpose(y, (0, 3, 1, 2))


if __name__ == "__main__":
    # conv_params = (input_channels, output_channels, avg_pool_size, batch_norm)
    conv_params = (4, 8, 2, True)
    Cin, Cout, pool, bn = conv_params
    N, H, W = 2, 16, 16

    key = jax.random.PRNGKey(0)
    kx, kw, kb = jax.random.split(key, 3)
    x = jax.random.normal(kx, (N, Cin, H, W), dtype=jnp.float32)

    # Deterministic parameter init (PyTorch Conv2d-style uniform bounds), HWIO weights.
    fan_in = Cin * 3 * 3
    bound = 1.0 / math.sqrt(fan_in)
    weight = jax.random.uniform(kw, (3, 3, Cin, Cout), jnp.float32, -bound, bound)
    bias = jax.random.uniform(kb, (Cout,), jnp.float32, -bound, bound)
    gamma = jnp.ones((Cout,), jnp.float32)     # BatchNorm2d weight at init
    beta = jnp.zeros((Cout,), jnp.float32)     # BatchNorm2d bias at init

    # BatchNorm path (two Pallas passes, bf16 intermediate).
    fwd = jax.jit(functools.partial(conv_block_forward,
                                    avg_pool_size=pool, batch_norm=bn))
    out = jax.block_until_ready(fwd(x, weight, bias, gamma, beta))
    ref = reference_forward(x, weight, bias, gamma, beta,
                            avg_pool_size=pool, batch_norm=bn)
    assert out.shape == (N, Cout, H // pool, W // pool), out.shape
    assert jnp.allclose(out, ref, atol=3e-3, rtol=3e-3), \
        float(jnp.max(jnp.abs(out - ref)))

    # No-BN path (single fused Pallas pass: conv + bias + ReLU + AvgPool).
    fwd_nobn = jax.jit(functools.partial(conv_block_forward,
                                         avg_pool_size=pool, batch_norm=False))
    out_nb = jax.block_until_ready(fwd_nobn(x, weight, bias, gamma, beta))
    ref_nb = reference_forward(x, weight, bias, gamma, beta,
                               avg_pool_size=pool, batch_norm=False)
    assert jnp.allclose(out_nb, ref_nb, atol=3e-3, rtol=3e-3), \
        float(jnp.max(jnp.abs(out_nb - ref_nb)))

    print("KERNEL_OK")
</pallas_src>

<mosaic_0001>
module attributes {stable_mosaic.version = 11 : i64} {
  func.func @_bn_relu_pool_kernel(%arg0: i32, %arg1: memref<8x32x128xbf16, #tpu.memory_space<vmem>>, %arg2: memref<1x1x128xf32, #tpu.memory_space<vmem>>, %arg3: memref<1x1x128xf32, #tpu.memory_space<vmem>>, %arg4: memref<8x8x32xf32, #tpu.memory_space<vmem>>, %arg5: memref<8x8x128xf32, #tpu.memory_space<vmem>>) attributes {dimension_semantics = [#tpu.dimension_semantics<parallel>], iteration_bounds = array<i64: 2>, scalar_prefetch = 0 : i64, scratch_operands = 0 : i64, tpu.core_type = #tpu.core_type<tc>, window_params = [{transform_indices = @transform_0, window_bounds = array<i64: 8, 32, 128>}, {pipeline_mode = #tpu.pipeline_mode<synchronous>, transform_indices = @transform_1, window_bounds = array<i64: 1, 1, 128>}, {pipeline_mode = #tpu.pipeline_mode<synchronous>, transform_indices = @transform_2, window_bounds = array<i64: 1, 1, 128>}, {pipeline_mode = #tpu.pipeline_mode<synchronous>, transform_indices = @transform_3, window_bounds = array<i64: 8, 8, 32>}, {transform_indices = @transform_4, window_bounds = array<i64: 8, 8, 128>}]} {
    %c0 = arith.constant 0 : index
    %c0_0 = arith.constant 0 : index
    %c0_1 = arith.constant 0 : index
    %0 = vector.load %arg1[%c0, %c0_0, %c0_1] : memref<8x32x128xbf16, #tpu.memory_space<vmem>>, vector<8x32x128xbf16>
    %1 = arith.extf %0 : vector<8x32x128xbf16> to vector<8x32x128xf32>
    %c0_2 = arith.constant 0 : index
    %c0_3 = arith.constant 0 : index
    %c0_4 = arith.constant 0 : index
    %2 = vector.load %arg2[%c0_2, %c0_3, %c0_4] : memref<1x1x128xf32, #tpu.memory_space<vmem>>, vector<1x1x128xf32>
    %3 = vector.broadcast %2 : vector<1x1x128xf32> to vector<8x32x128xf32>
    %4 = arith.mulf %1, %3 : vector<8x32x128xf32>
    %c0_5 = arith.constant 0 : index
    %c0_6 = arith.constant 0 : index
    %c0_7 = arith.constant 0 : index
    %5 = vector.load %arg3[%c0_5, %c0_6, %c0_7] : memref<1x1x128xf32, #tpu.memory_space<vmem>>, vector<1x1x128xf32>
    %6 = vector.broadcast %5 : vector<1x1x128xf32> to vector<8x32x128xf32>
    %7 = arith.addf %4, %6 : vector<8x32x128xf32>
    %cst = arith.constant 0.000000e+00 : f32
    %8 = vector.broadcast %cst : f32 to vector<8x32x128xf32>
    %9 = arith.maximumf %7, %8 : vector<8x32x128xf32>
    %c0_8 = arith.constant 0 : index
    %c0_9 = arith.constant 0 : index
    %c0_10 = arith.constant 0 : index
    %10 = vector.load %arg4[%c0_8, %c0_9, %c0_10] : memref<8x8x32xf32, #tpu.memory_space<vmem>>, vector<8x8x32xf32>
    "tpu.trace_start"() <{level = 10 : i32, message = "gop,gpc->goc"}> : () -> ()
    %cst_11 = arith.constant dense<0.000000e+00> : vector<8x8x128xf32>
    %11 = tpu.matmul %10, %9, %cst_11 {dimension_numbers = #tpu.dot_dimension_numbers<[2], [1], [1], [2], [0, 0, 0, 1, 1, 2], [0], [0]>} : vector<8x8x32xf32>, vector<8x32x128xf32>, vector<8x8x128xf32> -> vector<8x8x128xf32>
    "tpu.trace_stop"() : () -> ()
    %c0_12 = arith.constant 0 : index
    %c0_13 = arith.constant 0 : index
    %c0_14 = arith.constant 0 : index
    %12 = vector.load %arg5[%c0_12, %c0_13, %c0_14] : memref<8x8x128xf32, #tpu.memory_space<vmem>>, vector<8x8x128xf32>
    tpu.vector_store %arg5[%c0_12, %c0_13, %c0_14], %11 {strides = array<i32>} : memref<8x8x128xf32, #tpu.memory_space<vmem>>, vector<8x8x128xf32>,
    return
  }
  func.func @transform_0(%arg0: i32) -> (i32, i32, i32) {
    %c0_i32 = arith.constant 0 : i32
    %c0_i32_0 = arith.constant 0 : i32
    %c0_i32_1 = arith.constant 0 : i32
    return %arg0, %c0_i32, %c0_i32_0 : i32, i32, i32
  }
  func.func @transform_1(%arg0: i32) -> (i32, i32, i32) {
    %c0_i32 = arith.constant 0 : i32
    %c0_i32_0 = arith.constant 0 : i32
    %c0_i32_1 = arith.constant 0 : i32
    %c0_i32_2 = arith.constant 0 : i32
    return %c0_i32, %c0_i32_0, %c0_i32_1 : i32, i32, i32
  }
  func.func @transform_2(%arg0: i32) -> (i32, i32, i32) {
    %c0_i32 = arith.constant 0 : i32
    %c0_i32_0 = arith.constant 0 : i32
    %c0_i32_1 = arith.constant 0 : i32
    %c0_i32_2 = arith.constant 0 : i32
    return %c0_i32, %c0_i32_0, %c0_i32_1 : i32, i32, i32
  }
  func.func @transform_3(%arg0: i32) -> (i32, i32, i32) {
    %c0_i32 = arith.constant 0 : i32
    %c0_i32_0 = arith.constant 0 : i32
    %c0_i32_1 = arith.constant 0 : i32
    %c0_i32_2 = arith.constant 0 : i32
    return %c0_i32, %c0_i32_0, %c0_i32_1 : i32, i32, i32
  }
  func.func @transform_4(%arg0: i32) -> (i32, i32, i32) {
    %c0_i32 = arith.constant 0 : i32
    %c0_i32_0 = arith.constant 0 : i32
    %c0_i32_1 = arith.constant 0 : i32
    return %arg0, %c0_i32, %c0_i32_0 : i32, i32, i32
  }
}

module attributes {stable_mosaic.version = 11 : i64} {
  func.func @_conv_stats_kernel(%arg0: i32, %arg1: memref<256x40xbf16, #tpu.memory_space<vmem>>, %arg2: memref<40x128xbf16, #tpu.memory_space<vmem>>, %arg3: memref<256x128xbf16, #tpu.memory_space<vmem>>, %arg4: memref<1x2x128xf32, #tpu.memory_space<vmem>>) attributes {dimension_semantics = [#tpu.dimension_semantics<parallel>], iteration_bounds = array<i64: 2>, scalar_prefetch = 0 : i64, scratch_operands = 0 : i64, tpu.core_type = #tpu.core_type<tc>, window_params = [{transform_indices = @transform_0, window_bounds = array<i64: 256, 40>}, {pipeline_mode = #tpu.pipeline_mode<synchronous>, transform_indices = @transform_1, window_bounds = array<i64: 40, 128>}, {transform_indices = @transform_2, window_bounds = array<i64: 256, 128>}, {transform_indices = @transform_3, window_bounds = array<i64: 1, 2, 128>}]} {
    %c0 = arith.constant 0 : index
    %c0_0 = arith.constant 0 : index
    %0 = vector.load %arg1[%c0, %c0_0] : memref<256x40xbf16, #tpu.memory_space<vmem>>, vector<256x40xbf16>
    %c0_1 = arith.constant 0 : index
    %c0_2 = arith.constant 0 : index
    %1 = vector.load %arg2[%c0_1, %c0_2] : memref<40x128xbf16, #tpu.memory_space<vmem>>, vector<40x128xbf16>
    %cst = arith.constant dense<0.000000e+00> : vector<256x128xf32>
    %2 = tpu.matmul %0, %1, %cst {dimension_numbers = #tpu.dot_dimension_numbers<[1], [0], [0], [1], [0, 0, 1, 1], [], []>} : vector<256x40xbf16>, vector<40x128xbf16>, vector<256x128xf32> -> vector<256x128xf32>
    %3 = arith.truncf %2 : vector<256x128xf32> to vector<256x128xbf16>
    %c0_3 = arith.constant 0 : index
    %c0_4 = arith.constant 0 : index
    %4 = vector.load %arg3[%c0_3, %c0_4] : memref<256x128xbf16, #tpu.memory_space<vmem>>, vector<256x128xbf16>
    tpu.vector_store %arg3[%c0_3, %c0_4], %3 {strides = array<i32>} : memref<256x128xbf16, #tpu.memory_space<vmem>>, vector<256x128xbf16>,
    %cst_5 = arith.constant dense<0.000000e+00> : vector<128xf32>
    %5 = vector.multi_reduction <add>, %2, %cst_5 [0] : vector<256x128xf32> to vector<128xf32>
    %6 = vector.shape_cast %5 : vector<128xf32> to vector<1x128xf32>
    %7 = arith.mulf %2, %2 : vector<256x128xf32>
    %cst_6 = arith.constant dense<0.000000e+00> : vector<128xf32>
    %8 = vector.multi_reduction <add>, %7, %cst_6 [0] : vector<256x128xf32> to vector<128xf32>
    %9 = vector.shape_cast %8 : vector<128xf32> to vector<1x128xf32>
    %10 = tpu.concatenate %6, %9 in 0 : vector<1x128xf32>, vector<1x128xf32> -> vector<2x128xf32>
    %c0_7 = arith.constant 0 : index
    %c0_8 = arith.constant 0 : index
    %c0_9 = arith.constant 0 : index
    %11 = vector.load %arg4[%c0_7, %c0_8, %c0_9] : memref<1x2x128xf32, #tpu.memory_space<vmem>>, vector<1x2x128xf32>
    %12 = vector.shape_cast %11 : vector<1x2x128xf32> to vector<2x128xf32>
    %13 = vector.shape_cast %10 : vector<2x128xf32> to vector<1x2x128xf32>
    tpu.vector_store %arg4[%c0_7, %c0_8, %c0_9], %13 {strides = array<i32>} : memref<1x2x128xf32, #tpu.memory_space<vmem>>, vector<1x2x128xf32>,
    return
  }
  func.func @transform_0(%arg0: i32) -> (i32, i32) {
    %c0_i32 = arith.constant 0 : i32
    %c0_i32_0 = arith.constant 0 : i32
    return %arg0, %c0_i32 : i32, i32
  }
  func.func @transform_1(%arg0: i32) -> (i32, i32) {
    %c0_i32 = arith.constant 0 : i32
    %c0_i32_0 = arith.constant 0 : i32
    %c0_i32_1 = arith.constant 0 : i32
    return %c0_i32, %c0_i32_0 : i32, i32
  }
  func.func @transform_2(%arg0: i32) -> (i32, i32) {
    %c0_i32 = arith.constant 0 : i32
    %c0_i32_0 = arith.constant 0 : i32
    return %arg0, %c0_i32 : i32, i32
  }
  func.func @transform_3(%arg0: i32) -> (i32, i32, i32) {
    %c0_i32 = arith.constant 0 : i32
    %c0_i32_0 = arith.constant 0 : i32
    %c0_i32_1 = arith.constant 0 : i32
    return %arg0, %c0_i32, %c0_i32_0 : i32, i32, i32
  }
}

</mosaic_0001>

<bundles_post_ra>
// kernel: conv_block_forward.3
= control target key start
LH: loop header
LB: loop body
LE: loop exit
PB: predicated region body
PF: predicated region fallthrough
CT: control target
= control target key end

     0   :  { %s1360_s15 = smov 0   ;;  %s1537_s0 = inlined_call_operand.vmem [shape: bf16[16,32,128], index: 0, kind: input, shape index: {}]   ;;  %s1538_s1 = inlined_call_operand.vmem [shape: f32[1,1,128], index: 1, kind: input, shape index: {}]   ;;  %s1539_s2 = inlined_call_operand.vmem [shape: f32[1,1,128], index: 2, kind: input, shape index: {}]   ;;  %s1540_s3 = inlined_call_operand.vmem [shape: f32[8,8,32], index: 3, kind: input, shape index: {}]   ;;  %s1541_s4 = inlined_call_operand.vmem [shape: f32[16,8,128], index: 4, kind: output, shape index: {}]  }
   0x1 LB: > { %s1035_s16 = sadd.s32 4294967295, %s1330_s15   ;;  %p1039_p0 = scmp.ge.s32.totalorder %s1330_s15, 1  ;;  %s1330_s15 = sphi %s1360_s15, %s14_s15  }
   0x2   : > { %p164_p1 = scmp.lt.s32.totalorder %s1330_s15, 3 }
   0x4   : > { %p165_p2 = pnand %p1039_p0, %p164_p1 }
   0x5   : > { %s1040_s17 = sshll.u32 (!%p165_p2), %s1035_s16, 3  ;;  %v1332_v0 = vmov (!%p165_p2), 0.0|0.0   ;;  %vm1333_vm0 = vmmov (!%p165_p2), 0   ;;  %v1334_v1 = vmov (!%p165_p2), 0.0   ;;  %v1385_v2 = vld [vmem:[%s1538_s1] ss:$0 sm:$0xff] (!%p165_p2) }
   0x6   : > { %168 = sbr.rel (%p165_p2) target bundleno = 274 (0x112), region = 36  ;;  %1265 = vmatprep.subr.bf16.mxu0 (!%p165_p2), %v1332_v0  ;;  %1271 = vmatprep.subr.bf16.mxu1 (!%p165_p2), %v1332_v0  ;;  %p192_p3 = scmp.lt.s32.totalorder (!%p165_p2), %s1040_s17, 15  ;;  %v1394_v11 = vld [vmem:[%s1539_s2] ss:$0 sm:$0xff] (!%p165_p2)  ;;  %vm386_vm1 = vcmask (!%p165_p2), 261120  }
   0x7   : > { %1185 = vmatprep.mubr.msk.f32.mxu0 (!%p165_p2), %vm1333_vm0, %v1334_v1  ;;  %1196 = vmatprep.mubr.msk.f32.mxu1 (!%p165_p2), %vm1333_vm0, %v1334_v1 }
   0xd   : > { %s1543_s17 = smov (!%p192_p3, %s1040_s17), 15 }
   0xe   : > { %s1057_s18 = sshll.u32 %s1543_s17, 4 }
   0xf   : > { %s1380_s21 = scalar_lea.vmem %s1537_s0, %s1057_s18  ;;  %s1044_s18 = sshll.u32 %s1543_s17, 3 }
  0x10   : > { %v1059_v3 = vld [vmem:[%s1380_s21] sm:$0xff]   ;;  %v1123_v4 = vld [vmem:[%s1380_s21 + $0x10] sm:$0xff]   ;;  %v1122_v5 = vld [vmem:[%s1380_s21 + $0x8] sm:$0xff]  }
  0x11   : > { %v1060_v6 = vunpack.c.l.bf16 %v1059_v3  ;;  %v1061_v7 = vunpack.c.h.bf16 %v1059_v3  ;;  %v1068_v8 = vunpack.c.l.bf16 %v1123_v4  ;;  %v1069_v9 = vunpack.c.h.bf16 %v1123_v4  ;;  %v1124_v10 = vld [vmem:[%s1380_s21 + $0x18] sm:$0xff]   ;;  %v1125_v32 = vld [vmem:[%s1380_s21 + $0x20] sm:$0xff]   ;;  %v1127_v37 = vld [vmem:[%s1380_s21 + $0x30] sm:$0xff]  }
  0x12   : > { %v1064_v12 = vunpack.c.l.bf16 %v1122_v5  ;;  %v1065_v13 = vunpack.c.h.bf16 %v1122_v5  ;;  %v1072_v14 = vunpack.c.l.bf16 %v1124_v10  ;;  %v1073_v15 = vunpack.c.h.bf16 %v1124_v10  ;;  %v1126_v42 = vld [vmem:[%s1380_s21 + $0x28] sm:$0xff]   ;;  %v1128_v47 = vld [vmem:[%s1380_s21 + $0x38] sm:$0xff]  }
  0x13   : > { %v275_v16 = vmul.f32 %v1060_v6, %v1385_v2  ;;  %v276_v17 = vmul.f32 %v1061_v7, %v1385_v2  ;;  %v279_v18 = vmul.f32 %v1068_v8, %v1385_v2  ;;  %v280_v19 = vmul.f32 %v1069_v9, %v1385_v2  ;;  %v1129_v7 = vld [vmem:[%s1380_s21 + $0x40] sm:$0xff]   ;;  %v379_v9 = vld [vmem:[%s1540_s3 + $0x8] sm:$0xff] }
  0x14   : > { %v277_v20 = vmul.f32 %v1064_v12, %v1385_v2  ;;  %v278_v21 = vmul.f32 %v1065_v13, %v1385_v2  ;;  %v281_v22 = vmul.f32 %v1072_v14, %v1385_v2  ;;  %v282_v23 = vmul.f32 %v1073_v15, %v1385_v2  ;;  %v378_v8 = vld [vmem:[%s1540_s3] sm:$0xff] }
  0x15   : > { %v314_v24 = vadd.f32 %v1394_v11, %v275_v16  ;;  %v315_v25 = vadd.f32 %v1394_v11, %v276_v17  ;;  %v318_v26 = vadd.f32 %v1394_v11, %v279_v18  ;;  %v319_v27 = vadd.f32 %v1394_v11, %v280_v19  ;;  %v1131_v19 = vld [vmem:[%s1380_s21 + $0x50] sm:$0xff]  }
  0x16   : > { %v316_v28 = vadd.f32 %v1394_v11, %v277_v20  ;;  %v317_v29 = vadd.f32 %v1394_v11, %v278_v21  ;;  %v320_v30 = vadd.f32 %v1394_v11, %v281_v22  ;;  %v321_v31 = vadd.f32 %v1394_v11, %v282_v23 }
  0x17   : > { %v346_v33 = vmax.f32 %v314_v24, 0.0  ;;  %v347_v34 = vmax.f32 %v315_v25, 0.0  ;;  %v350_v35 = vmax.f32 %v318_v26, 0.0  ;;  %v351_v36 = vmax.f32 %v319_v27, 0.0  ;;  %v1130_v24 = vld [vmem:[%s1380_s21 + $0x48] sm:$0xff]  }
  0x18   : > { %v348_v38 = vmax.f32 %v316_v28, 0.0  ;;  %v349_v39 = vmax.f32 %v317_v29, 0.0  ;;  %v352_v40 = vmax.f32 %v320_v30, 0.0  ;;  %v353_v41 = vmax.f32 %v321_v31, 0.0  ;;  %v1132_v29 = vld [vmem:[%s1380_s21 + $0x58] sm:$0xff]  }
  0x19   : > { %v1266_v43 = vpack.c.bf16 %v347_v34, %v346_v33  ;;  %v1272_v44 = vpack.c.bf16 %v351_v36, %v350_v35  ;;  %v1076_v45 = vunpack.c.l.bf16 %v1125_v32  ;;  %v1077_v46 = vunpack.c.h.bf16 %v1125_v32 }
  0x1a   : > { %v1269_v48 = vpack.c.bf16 %v349_v39, %v348_v38  ;;  %v1275_v49 = vpack.c.bf16 %v353_v41, %v352_v40  ;;  %v1084_v50 = vunpack.c.l.bf16 %v1127_v37  ;;  %v1085_v51 = vunpack.c.h.bf16 %v1127_v37 }
  0x1b   : > { %1267 = vmatpush3.bf16.msra.mxu0 %v1266_v43  ;;  %1273 = vmatpush3.bf16.msra.mxu1 %v1272_v44  ;;  %v283_v52 = vmul.f32 %v1076_v45, %v1385_v2  ;;  %v284_v53 = vmul.f32 %v1077_v46, %v1385_v2  ;;  %v1080_v54 = vunpack.c.l.bf16 %v1126_v42  ;;  %v1081_v55 = vunpack.c.h.bf16 %v1126_v42  ;;  %v1133_v46 = vld [vmem:[%s1380_s21 + $0x60] sm:$0xff]  }
  0x1c   : > { %1268 = vmatprep.subr.bf16.mxu0 %v1332_v0  ;;  %1274 = vmatprep.subr.bf16.mxu1 %v1332_v0  ;;  %v287_v56 = vmul.f32 %v1084_v50, %v1385_v2  ;;  %v288_v57 = vmul.f32 %v1085_v51, %v1385_v2  ;;  %v1088_v58 = vunpack.c.l.bf16 %v1128_v47  ;;  %v1089_v59 = vunpack.c.h.bf16 %v1128_v47  ;;  %v380_v47 = vld [vmem:[%s1540_s3 + $0x10] sm:$0xff] }
  0x1d   : > { %v322_v60 = vadd.f32 %v1394_v11, %v283_v52  ;;  %v323_v61 = vadd.f32 %v1394_v11, %v284_v53  ;;  %v285_v62 = vmul.f32 %v1080_v54, %v1385_v2  ;;  %v286_v63 = vmul.f32 %v1081_v55, %v1385_v2  ;;  %v381_v52 = vld [vmem:[%s1540_s3 + $0x18] sm:$0xff] }
  0x1e   : > { %v326_v3 = vadd.f32 %v1394_v11, %v287_v56  ;;  %v327_v4 = vadd.f32 %v1394_v11, %v288_v57  ;;  %v289_v5 = vmul.f32 %v1088_v58, %v1385_v2  ;;  %v290_v6 = vmul.f32 %v1089_v59, %v1385_v2 }
  0x1f   : > { %1270 = vmatpush3.bf16.msra.mxu0 %v1269_v48  ;;  %1276 = vmatpush3.bf16.msra.mxu1 %v1275_v49  ;;  %v354_v10 = vmax.f32 %v322_v60, 0.0  ;;  %v355_v12 = vmax.f32 %v323_v61, 0.0  ;;  %v324_v13 = vadd.f32 %v1394_v11, %v285_v62  ;;  %v325_v14 = vadd.f32 %v1394_v11, %v286_v63  ;;  %v1135_v61 = vld [vmem:[%s1380_s21 + $0x70] sm:$0xff]  }
  0x20   : > { %1277 = vmatprep.subr.bf16.mxu0 %v1332_v0  ;;  %1283 = vmatprep.subr.bf16.mxu1 %v1332_v0  ;;  %v358_v15 = vmax.f32 %v326_v3, 0.0  ;;  %v359_v16 = vmax.f32 %v327_v4, 0.0  ;;  %v328_v17 = vadd.f32 %v1394_v11, %v289_v5  ;;  %v329_v18 = vadd.f32 %v1394_v11, %v290_v6  ;;  %v1134_v5 = vld [vmem:[%s1380_s21 + $0x68] sm:$0xff]  }
  0x21   : > { %v1278_v20 = vpack.c.bf16 %v355_v12, %v354_v10  ;;  %v356_v21 = vmax.f32 %v324_v13, 0.0  ;;  %v357_v22 = vmax.f32 %v325_v14, 0.0  ;;  %v1092_v23 = vunpack.c.l.bf16 %v1129_v7  ;;  %v1136_v10 = vld [vmem:[%s1380_s21 + $0x78] sm:$0xff]   ;;  %s202_s21 = scalar_lea.vmem %s1541_s4, %s1044_s18 }
  0x22   : > { %1186 = vmatmul.mubr.msk.f32.vlgmr.msra.gmra.mrb[0].mxu0 %vm386_vm1, %v378_v8  ;;  %1197 = vmatmul.mubr.msk.f32.vlgmr.msra.gmra.mrb[0].mxu1 %vm386_vm1, %v379_v9  ;;  %v1284_v25 = vpack.c.bf16 %v359_v16, %v358_v15  ;;  %v360_v26 = vmax.f32 %v328_v17, 0.0  ;;  %v361_v27 = vmax.f32 %v329_v18, 0.0  ;;  %v1093_v28 = vunpack.c.h.bf16 %v1129_v7 }
  0x23   : > { %1279 = vmatpush3.bf16.msra.mxu0 %v1278_v20  ;;  %v1281_v30 = vpack.c.bf16 %v357_v22, %v356_v21  ;;  %1207 = vmatprep.mubr.msk.f32.mxu0 %vm1333_vm0, %v1334_v1  ;;  %v291_v31 = vmul.f32 %v1092_v23, %v1385_v2  ;;  %v1100_v32 = vunpack.c.l.bf16 %v1131_v19  ;;  %v1101_v33 = vunpack.c.h.bf16 %v1131_v19 }
  0x24   : > { %1285 = vmatpush3.bf16.msra.mxu1 %v1284_v25  ;;  %1280 = vmatprep.subr.bf16.mxu0 %v1332_v0  ;;  %v1287_v34 = vpack.c.bf16 %v361_v27, %v360_v26  ;;  %v292_v35 = vmul.f32 %v1093_v28, %v1385_v2  ;;  %v1096_v36 = vunpack.c.l.bf16 %v1130_v24  ;;  %v1097_v37 = vunpack.c.h.bf16 %v1130_v24  ;;  %v382_v28 = vld [vmem:[%s1540_s3 + $0x20] sm:$0xff] }
  0x25   : > { %1286 = vmatprep.subr.bf16.mxu1 %v1332_v0  ;;  %1218 = vmatprep.mubr.msk.f32.mxu1 %vm1333_vm0, %v1334_v1  ;;  %v330_v38 = vadd.f32 %v1394_v11, %v291_v31  ;;  %v295_v39 = vmul.f32 %v1100_v32, %v1385_v2  ;;  %v296_v40 = vmul.f32 %v1101_v33, %v1385_v2  ;;  %v1104_v41 = vunpack.c.l.bf16 %v1132_v29  ;;  %v383_v33 = vld [vmem:[%s1540_s3 + $0x28] sm:$0xff] }
  0x26   : > { %v331_v42 = vadd.f32 %v1394_v11, %v292_v35  ;;  %v293_v43 = vmul.f32 %v1096_v36, %v1385_v2  ;;  %v294_v44 = vmul.f32 %v1097_v37, %v1385_v2  ;;  %v1105_v45 = vunpack.c.h.bf16 %v1132_v29 }
  0x27   : > { %1282 = vmatpush3.bf16.msra.mxu0 %v1281_v30  ;;  %v362_v48 = vmax.f32 %v330_v38, 0.0  ;;  %v334_v49 = vadd.f32 %v1394_v11, %v295_v39  ;;  %v335_v50 = vadd.f32 %v1394_v11, %v296_v40  ;;  %v297_v51 = vmul.f32 %v1104_v41, %v1385_v2 }
  0x28   : > { %1288 = vmatpush3.bf16.msra.mxu1 %v1287_v34  ;;  %1289 = vmatprep.subr.bf16.mxu0 %v1332_v0  ;;  %v363_v53 = vmax.f32 %v331_v42, 0.0  ;;  %v332_v54 = vadd.f32 %v1394_v11, %v293_v43  ;;  %v333_v55 = vadd.f32 %v1394_v11, %v294_v44  ;;  %v298_v56 = vmul.f32 %v1105_v45, %v1385_v2 }
  0x29   : > { %1295 = vmatprep.subr.bf16.mxu1 %v1332_v0  ;;  %v366_v57 = vmax.f32 %v334_v49, 0.0  ;;  %v367_v58 = vmax.f32 %v335_v50, 0.0  ;;  %v336_v59 = vadd.f32 %v1394_v11, %v297_v51  ;;  %v1108_v60 = vunpack.c.l.bf16 %v1133_v46  ;;  %v385_v49 = vld [vmem:[%s1540_s3 + $0x38] sm:$0xff] }
  0x2a   : > { %1208 = vmatmul.mubr.msk.f32.vlgmr.msra.gmra.mrb[2].mxu0 %vm386_vm1, %v380_v47  ;;  %v1290_v62 = vpack.c.bf16 %v363_v53, %v362_v48  ;;  %v364_v63 = vmax.f32 %v332_v54, 0.0  ;;  %v365_v3 = vmax.f32 %v333_v55, 0.0  ;;  %v337_v4 = vadd.f32 %v1394_v11, %v298_v56 }
  0x2b   : > { %1219 = vmatmul.mubr.msk.f32.vlgmr.msra.gmra.mrb[2].mxu1 %vm386_vm1, %v381_v52  ;;  %v1296_v6 = vpack.c.bf16 %v367_v58, %v366_v57  ;;  %v368_v7 = vmax.f32 %v336_v59, 0.0  ;;  %1229 = vmatprep.mubr.msk.f32.mxu0 %vm1333_vm0, %v1334_v1  ;;  %v1109_v8 = vunpack.c.h.bf16 %v1133_v46  ;;  %v299_v9 = vmul.f32 %v1108_v60, %v1385_v2 }
  0x2c   : > { %1291 = vmatpush3.bf16.msra.mxu0 %v1290_v62  ;;  %v1293_v12 = vpack.c.bf16 %v365_v3, %v364_v63  ;;  %v369_v13 = vmax.f32 %v337_v4, 0.0  ;;  %1240 = vmatprep.mubr.msk.f32.mxu1 %vm1333_vm0, %v1334_v1  ;;  %v1116_v14 = vunpack.c.l.bf16 %v1135_v61  ;;  %v1117_v15 = vunpack.c.h.bf16 %v1135_v61 }
  0x2d   : > { %1297 = vmatpush3.bf16.msra.mxu1 %v1296_v6  ;;  %1292 = vmatprep.subr.bf16.mxu0 %v1332_v0  ;;  %v300_v16 = vmul.f32 %v1109_v8, %v1385_v2  ;;  %v338_v17 = vadd.f32 %v1394_v11, %v299_v9  ;;  %v1112_v18 = vunpack.c.l.bf16 %v1134_v5  ;;  %v1113_v19 = vunpack.c.h.bf16 %v1134_v5 }
  0x2e   : > { %1298 = vmatprep.subr.bf16.mxu1 %v1332_v0  ;;  %v1299_v20 = vpack.c.bf16 %v369_v13, %v368_v7  ;;  %v303_v21 = vmul.f32 %v1116_v14, %v1385_v2  ;;  %v304_v22 = vmul.f32 %v1117_v15, %v1385_v2  ;;  %v1120_v23 = vunpack.c.l.bf16 %v1136_v10 }
  0x2f   : > { %v339_v24 = vadd.f32 %v1394_v11, %v300_v16  ;;  %v370_v25 = vmax.f32 %v338_v17, 0.0  ;;  %v301_v26 = vmul.f32 %v1112_v18, %v1385_v2  ;;  %v302_v27 = vmul.f32 %v1113_v19, %v1385_v2 }
  0x30   : > { %1294 = vmatpush3.bf16.msra.mxu0 %v1293_v12  ;;  %v342_v29 = vadd.f32 %v1394_v11, %v303_v21  ;;  %v343_v30 = vadd.f32 %v1394_v11, %v304_v22  ;;  %v1121_v31 = vunpack.c.h.bf16 %v1136_v10  ;;  %v305_v32 = vmul.f32 %v1120_v23, %v1385_v2 }
  0x31   : > { %1300 = vmatpush3.bf16.msra.mxu1 %v1299_v20  ;;  %1301 = vmatprep.subr.bf16.mxu0 %v1332_v0  ;;  %v371_v34 = vmax.f32 %v339_v24, 0.0  ;;  %v340_v35 = vadd.f32 %v1394_v11, %v301_v26  ;;  %v341_v36 = vadd.f32 %v1394_v11, %v302_v27 }
  0x32   : > { %1307 = vmatprep.subr.bf16.mxu1 %v1332_v0  ;;  %v374_v37 = vmax.f32 %v342_v29, 0.0  ;;  %v375_v38 = vmax.f32 %v343_v30, 0.0  ;;  %v306_v39 = vmul.f32 %v1121_v31, %v1385_v2  ;;  %v344_v40 = vadd.f32 %v1394_v11, %v305_v32 }
  0x33   : > { %1230 = vmatmul.mubr.msk.f32.vlgmr.msra.gmra.mrb[4].mxu0 %vm386_vm1, %v382_v28  ;;  %v1302_v41 = vpack.c.bf16 %v371_v34, %v370_v25  ;;  %v372_v42 = vmax.f32 %v340_v35, 0.0  ;;  %v373_v43 = vmax.f32 %v341_v36, 0.0 }
  0x34   : > { %1241 = vmatmul.mubr.msk.f32.vlgmr.msra.gmra.mrb[4].mxu1 %vm386_vm1, %v383_v33  ;;  %v1308_v44 = vpack.c.bf16 %v375_v38, %v374_v37  ;;  %v345_v45 = vadd.f32 %v1394_v11, %v306_v39  ;;  %v376_v46 = vmax.f32 %v344_v40, 0.0  ;;  %1251 = vmatprep.mubr.msk.f32.mxu0 %vm1333_vm0, %v1334_v1  ;;  %v384_v11 = vld [vmem:[%s1540_s3 + $0x30] sm:$0xff] }
  0x35   : > { %1303 = vmatpush3.bf16.msra.mxu0 %v1302_v41  ;;  %v1305_v47 = vpack.c.bf16 %v373_v43, %v372_v42  ;;  %1262 = vmatprep.mubr.msk.f32.mxu1 %vm1333_vm0, %v1334_v1 }
  0x36   : > { %1309 = vmatpush3.bf16.msra.mxu1 %v1308_v44  ;;  %1304 = vmatprep.subr.bf16.mxu0 %v1332_v0  ;;  %v377_v2 = vmax.f32 %v345_v45, 0.0 }
  0x37   : > { %1310 = vmatprep.subr.bf16.mxu1 %v1332_v0 }
  0x38   : > { %v1311_v48 = vpack.c.bf16 %v377_v2, %v376_v46 }
  0x39   : > { %1306 = vmatpush3.bf16.msra.mxu0 %v1305_v47 }
  0x3a   : > { %1312 = vmatpush3.bf16.msra.mxu1 %v1311_v48 }
  0x3c   : > { %1252 = vmatmul.mubr.msk.f32.vlgmr.msra.gmra.mrb[6].mxu0 %vm386_vm1, %v384_v11 }
  0x3d   : > { %1263 = vmatmul.mubr.msk.f32.vlgmr.msra.gmra.mrb[6].mxu1 %vm386_vm1, %v385_v49 }
  0xf5   : > { %v456_v0 = vpop.f32.mrb[0].mxu0  ;;  %v529_v1 = vpop.f32.mrb[0].mxu1 }
  0xf6   : > { %971 = vst [vmem:[%s202_s21] sm:$0xff] %v456_v0  ;;  %972 = vst [vmem:[%s202_s21 + $0x8] sm:$0xff] %v529_v1  ;;  %v1187_v50 = vpop.f32.mrb[1].mxu0  ;;  %v1198_v51 = vpop.f32.mrb[1].mxu1 }
  0xfd   : > { %v602_v52 = vpop.f32.mrb[2].mxu0 }
  0xfe   : > { %973 = vst [vmem:[%s202_s21 + $0x10] sm:$0xff] %v602_v52  ;;  %v675_v53 = vpop.f32.mrb[2].mxu1  ;;  %v1209_v54 = vpop.f32.mrb[3].mxu0 }
  0xff   : > { %974 = vst [vmem:[%s202_s21 + $0x18] sm:$0xff] %v675_v53  ;;  %v1220_v55 = vpop.f32.mrb[3].mxu1 }
 0x106   : > { %v748_v56 = vpop.f32.mrb[4].mxu0 }
 0x107   : > { %975 = vst [vmem:[%s202_s21 + $0x20] sm:$0xff] %v748_v56  ;;  %v821_v57 = vpop.f32.mrb[4].mxu1  ;;  %v1231_v58 = vpop.f32.mrb[5].mxu0 }
 0x108   : > { %976 = vst [vmem:[%s202_s21 + $0x28] sm:$0xff] %v821_v57  ;;  %v1242_v59 = vpop.f32.mrb[5].mxu1 }
 0x10f   : > { %v894_v60 = vpop.f32.mrb[6].mxu0 }
 0x110   : > { %977 = vst [vmem:[%s202_s21 + $0x30] sm:$0xff] %v894_v60  ;;  %v967_v61 = vpop.f32.mrb[6].mxu1  ;;  %v1253_v62 = vpop.f32.mrb[7].mxu0 }
 0x111   : > { %978 = vst [vmem:[%s202_s21 + $0x38] sm:$0xff] %v967_v61  ;;  %v1264_v63 = vpop.f32.mrb[7].mxu1 }
 0x112 PF: > { %s14_s15 = sadd.s32 1, %s1330_s15  }
 0x113   : > { %p11_p4 = scmp.ge.s32.totalorder %s14_s15, 4  }
 0x115   :  { %13 = sbr.rel (!%p11_p4) target bundleno = 1 (0x1), region = 66 }

// kernel: conv_block_forward.2
= control target key start
LH: loop header
LB: loop body
LE: loop exit
PB: predicated region body
PF: predicated region fallthrough
CT: control target
= control target key end

     0   :  { %s1214_s12 = smov 0   ;;  %s1373_s0 = inlined_call_operand.vmem [shape: bf16[512,40], index: 0, kind: input, shape index: {}]   ;;  %s1374_s1 = inlined_call_operand.vmem [shape: bf16[40,128], index: 1, kind: input, shape index: {}]   ;;  %s1375_s2 = inlined_call_operand.vmem [shape: bf16[512,128], index: 2, kind: output, shape index: {0}]   ;;  %s1376_s3 = inlined_call_operand.vmem [shape: f32[2,2,128], index: 3, kind: output, shape index: {1}]  }
   0x1 LB: > { %s1220_s13 = sadd.s32 4294967295, %s1192_s12   ;;  %p892_p0 = scmp.ge.s32.totalorder %s1192_s12, 1  ;;  %s1192_s12 = sphi %s1214_s12, %s14_s12  }
   0x2   : > { %p141_p1 = scmp.lt.s32.totalorder %s1192_s12, 3 }
   0x4   : > { %p142_p2 = pnand %p892_p0, %p141_p1 }
   0x5   : > { %v1167_v0 = vld [vmem:[%s1374_s1] sm:$0xff] (!%p142_p2)   ;;  %v1168_v1 = vld [vmem:[%s1374_s1 + $0x8] sm:$0xff] (!%p142_p2)   ;;  %s893_s18 = sshll.u32 (!%p142_p2), %s1220_s13, 5  ;;  %v1169_v2 = vld [vmem:[%s1374_s1 + $0x10] ss:$0 sps:$4 sm:$0xff] (!%p142_p2)   ;;  %vm367_vm0 = vcmask (!%p142_p2), 1043456  }
   0x6   : > { %145 = sbr.rel (%p142_p2) target bundleno = 311 (0x137), region = 28  ;;  %1113 = vmatprep.subr.bf16.mxu0 (!%p142_p2), %v1167_v0  ;;  %p170_p3 = scmp.lt.s32.totalorder (!%p142_p2), %s893_s18, 63  ;;  %1151 = vmatprep.subr.bf16.mxu1 (!%p142_p2), %v1167_v0  ;;  %vm318_vm1 = vcmask (!%p142_p2), 326656   ;;  %v369_v3 = vsel (!%p142_p2), %vm367_vm0, %v1169_v2, 0  ;;  %vm798_vm2 = vcmask (!%p142_p2), 1040384  }
   0x7   : > { %1114 = vmatpush3.bf16.msra.mxu0 (!%p142_p2), %v1167_v0  ;;  %1154 = vmatpush3.bf16.msra.mxu1 (!%p142_p2), %v1167_v0  ;;  %p181_p4 = scmp.lt.s32.totalorder (!%p142_p2), %s1220_s13, 1 }
   0x8   : > { %1115 = vmatprep.subr.bf16.mxu0 (!%p142_p2), %v1168_v1  ;;  %1152 = vmatprep.subr.bf16.mxu1 (!%p142_p2), %v1168_v1 }
   0xb   : > { %1116 = vmatpush3.bf16.msra.mxu0 (!%p142_p2), %v1168_v1  ;;  %1155 = vmatpush3.bf16.msra.mxu1 (!%p142_p2), %v1168_v1 }
   0xc   : > { %1157 = vmatprep.subr.msk.bf16.mxu0 (!%p142_p2), %vm367_vm0, %v1169_v2  ;;  %1158 = vmatprep.subr.msk.bf16.mxu1 (!%p142_p2), %vm367_vm0, %v1169_v2 }
   0xd   : > { %s1378_s18 = smov (!%p170_p3, %s893_s18), 63  ;;  %s1380_s13 = smov (!%p181_p4, %s1220_s13), 1 }
   0xe   : > { %s894_s21 = sshll.u32 %s1378_s18, 2  ;;  %s897_s28 = sshll.u32 %s1380_s13, 1 }
   0xf   : > { %s1242_s24 = scalar_lea.vmem %s1373_s0, %s894_s21  ;;  %1118 = vmatpush3.bf16.msra.mxu0 %v369_v3  ;;  %1156 = vmatpush3.bf16.msra.mxu1 %v369_v3  ;;  %s1281_s27 = scalar_lea.vmem %s1375_s2, %s894_s21 }
  0x10   : > { %v1170_v4 = vld [vmem:[%s1242_s24] sm:$0xff]   ;;  %v1171_v5 = vld [vmem:[%s1242_s24 + $0x8] sm:$0xff]   ;;  %v1172_v6 = vld [vmem:[%s1242_s24 + $0x10] sm:$0xff]   ;;  %s184_s4 = scalar_lea.vmem %s1376_s3, %s897_s28 }
  0x11   : > { %1119 = vmatprep.mubr.msk.bf16.mxu0 %vm318_vm1, %v1170_v4  ;;  %v1173_v7 = vld [vmem:[%s1242_s24 + $0x18] sm:$0xff]   ;;  %v1178_v8 = vld [vmem:[%s1242_s24 + $0x40] sm:$0xff]   ;;  %v1179_v9 = vld [vmem:[%s1242_s24 + $0x48] sm:$0xff]  }
  0x12   : > { %1120 = vmatmul.mubr.msk.bf16.vlgmr.msra.gmra.mrb[0].mxu0 %vm318_vm1, %v1171_v5  ;;  %1135 = vmatprep.mubr.msk.bf16.mxu1 %vm318_vm1, %v1178_v8  ;;  %v1180_v10 = vld [vmem:[%s1242_s24 + $0x50] sm:$0xff]   ;;  %v1174_v11 = vld [vmem:[%s1242_s24 + $0x20] sm:$0xff]   ;;  %v1181_v12 = vld [vmem:[%s1242_s24 + $0x58] sm:$0xff]  }
  0x13   : > { %1123 = vmatprep.mubr.msk.bf16.mxu0 %vm318_vm1, %v1172_v6  ;;  %1136 = vmatmul.mubr.msk.bf16.vlgmr.msra.gmra.mrb[0].mxu1 %vm318_vm1, %v1179_v9  ;;  %v1182_v13 = vld [vmem:[%s1242_s24 + $0x60] sm:$0xff]   ;;  %v1175_v14 = vld [vmem:[%s1242_s24 + $0x28] sm:$0xff]   ;;  %v1176_v15 = vld [vmem:[%s1242_s24 + $0x30] sm:$0xff]  }
  0x14   : > { %1139 = vmatprep.mubr.msk.bf16.mxu1 %vm318_vm1, %v1180_v10  ;;  %v1183_v16 = vld [vmem:[%s1242_s24 + $0x68] sm:$0xff]   ;;  %v1184_v17 = vld [vmem:[%s1242_s24 + $0x70] sm:$0xff]   ;;  %v1177_v18 = vld [vmem:[%s1242_s24 + $0x38] sm:$0xff]  }
  0x15   : > { %v1185_v19 = vld [vmem:[%s1242_s24 + $0x78] sm:$0xff]  }
  0x1a   : > { %1124 = vmatmul.mubr.msk.bf16.gmra.mrb[4].mxu0 %vm318_vm1, %v1173_v7 }
  0x1b   : > { %1127 = vmatprep.mubr.msk.bf16.mxu0 %vm318_vm1, %v1174_v11  ;;  %1140 = vmatmul.mubr.msk.bf16.gmra.mrb[4].mxu1 %vm318_vm1, %v1181_v12 }
  0x1c   : > { %1143 = vmatprep.mubr.msk.bf16.mxu1 %vm318_vm1, %v1182_v13 }
  0x22   : > { %1128 = vmatmul.mubr.msk.bf16.gmra.mrb[8].mxu0 %vm318_vm1, %v1175_v14 }
  0x23   : > { %1131 = vmatprep.mubr.msk.bf16.mxu0 %vm318_vm1, %v1176_v15  ;;  %1144 = vmatmul.mubr.msk.bf16.gmra.mrb[8].mxu1 %vm318_vm1, %v1183_v16 }
  0x24   : > { %1147 = vmatprep.mubr.msk.bf16.mxu1 %vm318_vm1, %v1184_v17 }
  0x2a   : > { %1132 = vmatmul.mubr.msk.bf16.gmra.mrb[12].mxu0 %vm318_vm1, %v1177_v18 }
  0x2b   : > { %1148 = vmatmul.mubr.msk.bf16.gmra.mrb[12].mxu1 %vm318_vm1, %v1185_v19 }
  0xe5   : > { %v1121_v20 = vpop.f32.mrb[0].mxu0 }
  0xe6   : > { %v405_v21 = vpop.f32.mrb[1].mxu0  ;;  %v1284_v29 = vpop.f32.mrb[0].mxu1  ;;  %v731_v30 = vmul.f32 %v1121_v20, %v1121_v20 }
  0xe7   : > { %v1122_v22 = vpop.f32.mrb[2].mxu0  ;;  %v729_v25 = vmul.f32 %v405_v21, %v405_v21  ;;  %v1287_v33 = vpop.f32.mrb[1].mxu1 }
  0xe8   : > { %v1007_v23 = vpack.c.bf16 %v1122_v22, %v1121_v20  ;;  %v408_v24 = vpop.f32.mrb[3].mxu0  ;;  %v1289_v34 = vpop.f32.mrb[2].mxu1  ;;  %v732_v35 = vmul.f32 %v1122_v22, %v1122_v22 }
  0xe9   : > { %v1002_v26 = vpack.c.bf16 %v408_v24, %v405_v21  ;;  %v692_v27 = vadd.f32 %v408_v24, %v405_v21  ;;  %v730_v28 = vmul.f32 %v408_v24, %v408_v24  ;;  %v1047_v39 = vpack.c.bf16 %v1289_v34, %v1284_v29  ;;  %v1293_v40 = vpop.f32.mrb[3].mxu1 }
  0xea   : > { %1079 = vst [vmem:[%s1281_s27 + $0x8] sm:$0xff] %v1007_v23   ;;  %v1042_v42 = vpack.c.bf16 %v1293_v40, %v1287_v33 }
  0xeb   : > { %1003 = vst [vmem:[%s1281_s27] sm:$0xff] %v1002_v26   ;;  %v693_v31 = vadd.f32 %v1121_v20, %v692_v27  ;;  %v761_v32 = vadd.f32 %v730_v28, %v729_v25  ;;  %1087 = vst [vmem:[%s1281_s27 + $0x48] sm:$0xff] %v1047_v39  }
  0xec   : > { %1086 = vst [vmem:[%s1281_s27 + $0x40] sm:$0xff] %v1042_v42  }
  0xed   : > { %v762_v36 = vadd.f32 %v761_v32, %v731_v30  ;;  %v1125_v37 = vpop.f32.mrb[4].mxu0  ;;  %v694_v38 = vadd.f32 %v1122_v22, %v693_v31 }
  0xee   : > { %v421_v41 = vpop.f32.mrb[5].mxu0  ;;  %v1300_v53 = vpop.f32.mrb[4].mxu1  ;;  %v735_v54 = vmul.f32 %v1125_v37, %v1125_v37 }
  0xef   : > { %v695_v43 = vadd.f32 %v694_v38, %v421_v41  ;;  %v733_v44 = vmul.f32 %v421_v41, %v421_v41  ;;  %v763_v45 = vadd.f32 %v762_v36, %v732_v35  ;;  %v1126_v46 = vpop.f32.mrb[6].mxu0  ;;  %v1303_v57 = vpop.f32.mrb[5].mxu1 }
  0xf0   : > { %v1017_v47 = vpack.c.bf16 %v1126_v46, %v1125_v37  ;;  %v424_v48 = vpop.f32.mrb[7].mxu0  ;;  %v1305_v58 = vpop.f32.mrb[6].mxu1  ;;  %v736_v59 = vmul.f32 %v1126_v46, %v1126_v46 }
  0xf1   : > { %v764_v49 = vadd.f32 %v763_v45, %v733_v44  ;;  %v1012_v50 = vpack.c.bf16 %v424_v48, %v421_v41  ;;  %v696_v51 = vadd.f32 %v695_v43, %v424_v48  ;;  %v734_v52 = vmul.f32 %v424_v48, %v424_v48  ;;  %v1309_v0 = vpop.f32.mrb[7].mxu1 }
  0xf2   : > { %1081 = vst [vmem:[%s1281_s27 + $0x18] sm:$0xff] %v1017_v47   ;;  %v1057_v63 = vpack.c.bf16 %v1305_v58, %v1300_v53  ;;  %v1052_v2 = vpack.c.bf16 %v1309_v0, %v1303_v57 }
  0xf3   : > { %1080 = vst [vmem:[%s1281_s27 + $0x10] sm:$0xff] %v1012_v50   ;;  %v697_v55 = vadd.f32 %v1125_v37, %v696_v51  ;;  %v765_v56 = vadd.f32 %v764_v49, %v734_v52 }
  0xf4   : > { %1089 = vst [vmem:[%s1281_s27 + $0x58] sm:$0xff] %v1057_v63   ;;  %1088 = vst [vmem:[%s1281_s27 + $0x50] sm:$0xff] %v1052_v2   ;;  %v748_v2 = vmul.f32 %v1289_v34, %v1289_v34 }
  0xf5   : > { %v766_v60 = vadd.f32 %v765_v56, %v735_v54  ;;  %v1129_v61 = vpop.f32.mrb[8].mxu0  ;;  %v698_v62 = vadd.f32 %v1126_v46, %v697_v55  ;;  %v745_v46 = vmul.f32 %v1287_v33, %v1287_v33 }
  0xf6   : > { %v437_v1 = vpop.f32.mrb[9].mxu0  ;;  %v1316_v13 = vpop.f32.mrb[8].mxu1  ;;  %v739_v14 = vmul.f32 %v1129_v61, %v1129_v61 }
  0xf7   : > { %v699_v3 = vadd.f32 %v698_v62, %v437_v1  ;;  %v737_v4 = vmul.f32 %v437_v1, %v437_v1  ;;  %v767_v5 = vadd.f32 %v766_v60, %v736_v59  ;;  %v1130_v6 = vpop.f32.mrb[10].mxu0  ;;  %v1319_v17 = vpop.f32.mrb[9].mxu1  ;;  %v747_v62 = vmul.f32 %v1284_v29, %v1284_v29 }
  0xf8   : > { %v1027_v7 = vpack.c.bf16 %v1130_v6, %v1129_v61  ;;  %v440_v8 = vpop.f32.mrb[11].mxu0  ;;  %v1321_v18 = vpop.f32.mrb[10].mxu1  ;;  %v740_v19 = vmul.f32 %v1130_v6, %v1130_v6 }
  0xf9   : > { %v768_v9 = vadd.f32 %v767_v5, %v737_v4  ;;  %v1022_v10 = vpack.c.bf16 %v440_v8, %v437_v1  ;;  %v700_v11 = vadd.f32 %v699_v3, %v440_v8  ;;  %v738_v12 = vmul.f32 %v440_v8, %v440_v8  ;;  %v504_v24 = vpop.f32.mrb[11].mxu1 }
  0xfa   : > { %1083 = vst [vmem:[%s1281_s27 + $0x28] sm:$0xff] %v1027_v7   ;;  %v1067_v23 = vpack.c.bf16 %v1321_v18, %v1316_v13  ;;  %v1062_v26 = vpack.c.bf16 %v504_v24, %v1319_v17  ;;  %v749_v4 = vmul.f32 %v1303_v57, %v1303_v57  ;;  %v750_v8 = vmul.f32 %v1309_v0, %v1309_v0 }
  0xfb   : > { %1082 = vst [vmem:[%s1281_s27 + $0x20] sm:$0xff] %v1022_v10   ;;  %v701_v15 = vadd.f32 %v1129_v61, %v700_v11  ;;  %v769_v16 = vadd.f32 %v768_v9, %v738_v12  ;;  %v746_v61 = vmul.f32 %v1293_v40, %v1293_v40 }
  0xfc   : > { %1091 = vst [vmem:[%s1281_s27 + $0x68] sm:$0xff] %v1067_v23   ;;  %1090 = vst [vmem:[%s1281_s27 + $0x60] sm:$0xff] %v1062_v26  }
  0xfd   : > { %v770_v20 = vadd.f32 %v769_v16, %v739_v14  ;;  %v1133_v21 = vpop.f32.mrb[12].mxu0  ;;  %v702_v22 = vadd.f32 %v1130_v6, %v701_v15 }
  0xfe   : > { %v453_v25 = vpop.f32.mrb[13].mxu0  ;;  %v1149_v41 = vpop.f32.mrb[12].mxu1  ;;  %v743_v42 = vmul.f32 %v1133_v21, %v1133_v21 }
  0xff   : > { %v703_v27 = vadd.f32 %v702_v22, %v453_v25  ;;  %v741_v28 = vmul.f32 %v453_v25, %v453_v25  ;;  %v771_v30 = vadd.f32 %v770_v20, %v740_v19  ;;  %v1134_v31 = vpop.f32.mrb[14].mxu0  ;;  %v517_v45 = vpop.f32.mrb[13].mxu1  ;;  %v754_v19 = vmul.f32 %v504_v24, %v504_v24 }
 0x100   : > { %v1037_v32 = vpack.c.bf16 %v1134_v31, %v1133_v21  ;;  %v456_v35 = vpop.f32.mrb[15].mxu0  ;;  %v1150_v47 = vpop.f32.mrb[14].mxu1  ;;  %v744_v48 = vmul.f32 %v1134_v31, %v1134_v31  ;;  %v755_v20 = vmul.f32 %v1316_v13, %v1316_v13  ;;  %v756_v22 = vmul.f32 %v1321_v18, %v1321_v18 }
 0x101   : > { %v772_v36 = vadd.f32 %v771_v30, %v741_v28  ;;  %v1032_v37 = vpack.c.bf16 %v456_v35, %v453_v25  ;;  %v704_v38 = vadd.f32 %v703_v27, %v456_v35  ;;  %v742_v39 = vmul.f32 %v456_v35, %v456_v35  ;;  %v520_v52 = vpop.f32.mrb[15].mxu1 }
 0x102   : > { %1085 = vst [vmem:[%s1281_s27 + $0x38] sm:$0xff] %v1037_v32   ;;  %v1077_v51 = vpack.c.bf16 %v1150_v47, %v1149_v41  ;;  %v1072_v54 = vpack.c.bf16 %v520_v52, %v517_v45  ;;  %v757_v25 = vmul.f32 %v517_v45, %v517_v45  ;;  %v759_v30 = vmul.f32 %v1149_v41, %v1149_v41 }
 0x103   : > { %1084 = vst [vmem:[%s1281_s27 + $0x30] sm:$0xff] %v1032_v37   ;;  %v705_v43 = vadd.f32 %v1133_v21, %v704_v38  ;;  %v773_v44 = vadd.f32 %v772_v36, %v742_v39  ;;  %v760_v35 = vmul.f32 %v1150_v47, %v1150_v47 }
 0x104   : > { %1093 = vst [vmem:[%s1281_s27 + $0x78] sm:$0xff] %v1077_v51   ;;  %1092 = vst [vmem:[%s1281_s27 + $0x70] sm:$0xff] %v1072_v54  }
 0x105   : > { %v774_v49 = vadd.f32 %v773_v44, %v743_v42  ;;  %v706_v50 = vadd.f32 %v1134_v31, %v705_v43 }
 0x107   : > { %v707_v55 = vadd.f32 %v706_v50, %v1287_v33  ;;  %v775_v56 = vadd.f32 %v774_v49, %v744_v48 }
 0x109   : > { %v776_v59 = vadd.f32 %v775_v56, %v745_v46  ;;  %v708_v60 = vadd.f32 %v707_v55, %v1293_v40 }
 0x10b   : > { %v709_v63 = vadd.f32 %v1284_v29, %v708_v60  ;;  %v777_v1 = vadd.f32 %v776_v59, %v746_v61  ;;  %v751_v29 = vmul.f32 %v1300_v53, %v1300_v53 }
 0x10d   : > { %v778_v3 = vadd.f32 %v777_v1, %v747_v62  ;;  %v710_v33 = vadd.f32 %v1289_v34, %v709_v63  ;;  %v752_v34 = vmul.f32 %v1305_v58, %v1305_v58 }
 0x10f   : > { %v711_v5 = vadd.f32 %v710_v33, %v1303_v57  ;;  %v779_v6 = vadd.f32 %v778_v3, %v748_v2  ;;  %v753_v57 = vmul.f32 %v1319_v17, %v1319_v17 }
 0x111   : > { %v780_v7 = vadd.f32 %v779_v6, %v749_v4  ;;  %v712_v40 = vadd.f32 %v711_v5, %v1309_v0 }
 0x113   : > { %v713_v9 = vadd.f32 %v1300_v53, %v712_v40  ;;  %v781_v10 = vadd.f32 %v780_v7, %v750_v8 }
 0x115   : > { %v782_v11 = vadd.f32 %v781_v10, %v751_v29  ;;  %v714_v12 = vadd.f32 %v1305_v58, %v713_v9 }
 0x117   : > { %v715_v14 = vadd.f32 %v714_v12, %v1319_v17  ;;  %v783_v15 = vadd.f32 %v782_v11, %v752_v34 }
 0x119   : > { %v784_v16 = vadd.f32 %v783_v15, %v753_v57  ;;  %v716_v0 = vadd.f32 %v715_v14, %v504_v24  ;;  %v758_v24 = vmul.f32 %v520_v52, %v520_v52 }
 0x11b   : > { %v717_v53 = vadd.f32 %v1316_v13, %v716_v0  ;;  %v785_v21 = vadd.f32 %v784_v16, %v754_v19 }
 0x11d   : > { %v786_v23 = vadd.f32 %v785_v21, %v755_v20  ;;  %v718_v58 = vadd.f32 %v1321_v18, %v717_v53 }
 0x11f   : > { %v719_v26 = vadd.f32 %v718_v58, %v517_v45  ;;  %v787_v17 = vadd.f32 %v786_v23, %v756_v22 }
 0x121   : > { %v788_v27 = vadd.f32 %v787_v17, %v757_v25  ;;  %v720_v28 = vadd.f32 %v719_v26, %v520_v52 }
 0x123   : > { %v721_v31 = vadd.f32 %v1149_v41, %v720_v28  ;;  %v789_v32 = vadd.f32 %v788_v27, %v758_v24 }
 0x125   : > { %v722_v13 = vadd.f32 %v1150_v47, %v721_v31  ;;  %v790_v36 = vadd.f32 %v789_v32, %v759_v30 }
 0x127   : > { %v723_v37 = vrot.slane %v722_v13, 4  ;;  %v791_v38 = vadd.f32 %v790_v36, %v760_v35 }
 0x129   : > { %v724_v39 = vadd.f32 %v723_v37, %v722_v13  ;;  %v792_v42 = vrot.slane %v791_v38, 4 }
 0x12b   : > { %v725_v43 = vrot.slane %v724_v39, 2  ;;  %v793_v18 = vadd.f32 %v792_v42, %v791_v38 }
 0x12d   : > { %v726_v44 = vadd.f32 %v725_v43, %v724_v39  ;;  %v794_v45 = vrot.slane %v793_v18, 2 }
 0x12f   : > { %v727_v46 = vrot.slane %v726_v44, 1  ;;  %v795_v48 = vadd.f32 %v794_v45, %v793_v18 }
 0x131   : > { %v796_v49 = vrot.slane %v795_v48, 1  ;;  %v728_v41 = vadd.f32 %v727_v46, %v726_v44 }
 0x133   : > { %v797_v47 = vadd.f32 %v796_v49, %v795_v48 }
 0x135   : > { %v799_v50 = vsel %vm798_vm2, %v728_v41, %v797_v47 }
 0x136   : > { %800 = vst [vmem:[%s184_s4] sm:$0x3] %v799_v50 }
 0x137 PF: > { %s14_s12 = sadd.s32 1, %s1192_s12  }
 0x138   : > { %p11_p5 = scmp.ge.s32.totalorder %s14_s12, 4  }
 0x13a   :  { %13 = sbr.rel (!%p11_p5) target bundleno = 1 (0x1), region = 70 }

</bundles_post_ra>
